<compile_context>
chip_gen: v7x
topology: tpu7x:2x2x1
jax: 0.10.0
libtpu: 0.0.40
codegen_flags: <defaults>
</compile_context>

<pallas_src>
import functools

import jax
import jax.numpy as jnp
from jax.experimental import pallas as pl
from jax.experimental.pallas import tpu as pltpu


# ---------------------------------------------------------------------------
# Pallas kernel: fused (r1(s,a) + r2(s,a)) / 2 forward pass.
# params_ref layout (all columns = 2H):
#   rows [0, obs)                 : W1_state   [obs, 2H]
#   rows [obs, obs+act)           : W1_action  [act, 2H]
#   rows [obs+act, obs+act+2H)    : W2 (block-diagonal) [2H, 2H]
#   row  rows-4                   : b1  [2H]
#   row  rows-3                   : b2  [2H]
#   row  rows-2                   : w3 row (pre-scaled by 0.5) [2H]
#   row  rows-1                   : b3 (pre-scaled, replicated across lanes)
# ---------------------------------------------------------------------------
def _reward_nets_kernel(state_ref, action_ref, params_ref, out_ref, *,
                        obs_dim, act_dim, hidden2):
    rows = obs_dim + act_dim + hidden2 + 4

    s = state_ref[...]                                        # [B, obs]
    a = action_ref[...]                                       # [B, act]

    w1s = params_ref[0:obs_dim, :]                            # [obs, 2H]
    w1a = params_ref[obs_dim:obs_dim + act_dim, :]            # [act, 2H]
    w2 = params_ref[obs_dim + act_dim:obs_dim + act_dim + hidden2, :]  # [2H, 2H]
    b1 = params_ref[rows - 4:rows - 3, :]                     # [1, 2H]
    b2 = params_ref[rows - 3:rows - 2, :]                     # [1, 2H]
    w3 = params_ref[rows - 2:rows - 1, :]                     # [1, 2H]
    b3 = params_ref[rows - 1:rows, 0:1]                       # [1, 1]

    def leaky_relu(v):
        # PyTorch nn.LeakyReLU default negative_slope = 0.01
        return jnp.where(v > 0, v, 0.01 * v)

    # Layer 1 (concat folded in: [s, a] @ W1 == s @ W1_s + a @ W1_a)
    h = (jnp.dot(s, w1s, preferred_element_type=jnp.float32)
         + jnp.dot(a, w1a, preferred_element_type=jnp.float32) + b1)
    h = leaky_relu(h)
    # Layer 2 (block-diagonal keeps the two nets independent)
    h = jnp.dot(h, w2, preferred_element_type=jnp.float32) + b2
    h = leaky_relu(h)
    # Layer 3: N=1 output -> VPU mul + lane reduction instead of an MXU push.
    r = jnp.sum(h * w3, axis=-1, keepdims=True) + b3          # [B, 1]
    out_ref[...] = r


@jax.jit
def reward_nets_forward(state, action, packed_params):
    """(r1(s,a) + r2(s,a)) / 2, shape [B, 1], float32."""
    B, obs_dim = state.shape
    act_dim = action.shape[1]
    hidden2 = packed_params.shape[0] - obs_dim - act_dim - 4

    kernel = functools.partial(_reward_nets_kernel,
                               obs_dim=obs_dim, act_dim=act_dim,
                               hidden2=hidden2)
    return pl.pallas_call(
        kernel,
        out_shape=jax.ShapeDtypeStruct((B, 1), jnp.float32),
        in_specs=[pl.BlockSpec(memory_space=pltpu.MemorySpace.VMEM)] * 3,
        out_specs=pl.BlockSpec(memory_space=pltpu.MemorySpace.VMEM),
    )(state, action, packed_params)


# ---------------------------------------------------------------------------
# Deterministic parameter construction mirroring weight_init():
#   Linear.weight <- orthogonal_ (gain=1), Linear.bias <- 0
# ---------------------------------------------------------------------------
def _orthogonal(key, out_dim, in_dim):
    """PyTorch-style nn.init.orthogonal_ for a [out_dim, in_dim] weight."""
    transpose = out_dim < in_dim
    big, small = (in_dim, out_dim) if transpose else (out_dim, in_dim)
    a = jax.random.normal(key, (big, small), dtype=jnp.float32)
    q, r = jnp.linalg.qr(a)
    q = q * jnp.sign(jnp.diag(r))  # make decomposition unique
    return q.T if transpose else q  # [out_dim, in_dim]


def make_reward_net_params(key, in_dim, hidden_dim):
    """Per-net params: weights as [in, out], biases as [1, out]."""
    k1, k2, k3 = jax.random.split(key, 3)
    w1 = _orthogonal(k1, hidden_dim, in_dim).T          # [in_dim, hidden]
    b1 = jnp.zeros((1, hidden_dim), jnp.float32)
    w2 = _orthogonal(k2, hidden_dim, hidden_dim).T      # [hidden, hidden]
    b2 = jnp.zeros((1, hidden_dim), jnp.float32)
    w3 = _orthogonal(k3, 1, hidden_dim).T               # [hidden, 1]
    b3 = jnp.zeros((1, 1), jnp.float32)
    return (w1, b1, w2, b2, w3, b3)


def pack_reward_nets_params(params1, params2, obs_dim):
    """Fuse the two reward nets into one packed f32 buffer (done once)."""
    w1a, b1a, w2a, b2a, w3a, b3a = params1
    w1b, b1b, w2b, b2b, w3b, b3b = params2
    in_dim, H = w1a.shape
    H2 = 2 * H

    # Layer 1: concat along output features, then split by input rows.
    W1 = jnp.concatenate([w1a, w1b], axis=1)                  # [in_dim, 2H]
    W1_s, W1_a = W1[:obs_dim], W1[obs_dim:]
    # Layer 2: block-diagonal (exact zeros off-diagonal).
    W2 = jnp.zeros((H2, H2), jnp.float32)
    W2 = W2.at[:H, :H].set(w2a).at[H:, H:].set(w2b)
    # Layer 3 + averaging: pre-scale by 0.5.
    w3_row = 0.5 * jnp.concatenate([w3a[:, 0], w3b[:, 0]])    # [2H]
    b1 = jnp.concatenate([b1a[0], b1b[0]])                    # [2H]
    b2 = jnp.concatenate([b2a[0], b2b[0]])                    # [2H]
    b3 = 0.5 * (b3a[0, 0] + b3b[0, 0])
    tail = jnp.stack([b1, b2, w3_row, jnp.full((H2,), b3, jnp.float32)])

    packed = jnp.concatenate([W1_s, W1_a, W2, tail], axis=0)  # [obs+act+2H+4, 2H]
    return packed.astype(jnp.float32)


# ---------------------------------------------------------------------------
# Pure-JAX reference (unfused two-net formulation) for a sanity check.
# ---------------------------------------------------------------------------
def _ref_forward(state, action, params1, params2):
    x = jnp.concatenate([state, action], axis=1).astype(jnp.float32)

    def mlp(p):
        w1, b1, w2, b2, w3, b3 = p
        h = jax.nn.leaky_relu(x @ w1 + b1, 0.01)
        h = jax.nn.leaky_relu(h @ w2 + b2, 0.01)
        return h @ w3 + b3

    return (mlp(params1) + mlp(params2)) / 2


if __name__ == "__main__":
    key = jax.random.PRNGKey(0)
    k_state, k_action, k_p1, k_p2 = jax.random.split(key, 4)

    batch = 8
    obs_dim = 24
    act_dim = 8
    hidden_dim = 32
    in_dim = obs_dim + act_dim

    state = jax.random.normal(k_state, (batch, obs_dim), dtype=jnp.float32)
    action = jax.random.normal(k_action, (batch, act_dim), dtype=jnp.float32)

    params1 = make_reward_net_params(k_p1, in_dim, hidden_dim)
    params2 = make_reward_net_params(k_p2, in_dim, hidden_dim)
    packed = pack_reward_nets_params(params1, params2, obs_dim)

    out = reward_nets_forward(state, action, packed)
    out = jax.block_until_ready(out)

    ref = _ref_forward(state, action, params1, params2)
    assert out.shape == (batch, 1)
    assert jnp.allclose(out, ref, atol=1e-4, rtol=1e-4)

    print("KERNEL_OK")
</pallas_src>

<mosaic_0001>
module attributes {stable_mosaic.version = 11 : i64} {
  func.func @_reward_nets_kernel(%arg0: memref<8x24xf32, #tpu.memory_space<vmem>>, %arg1: memref<8x8xf32, #tpu.memory_space<vmem>>, %arg2: memref<100x64xf32, #tpu.memory_space<vmem>>, %arg3: memref<8x1xf32, #tpu.memory_space<vmem>>) attributes {dimension_semantics = [], scalar_prefetch = 0 : i64, scratch_operands = 0 : i64, tpu.core_type = #tpu.core_type<tc>} {
    %c0 = arith.constant 0 : index
    %c0_0 = arith.constant 0 : index
    %0 = vector.load %arg0[%c0, %c0_0] : memref<8x24xf32, #tpu.memory_space<vmem>>, vector<8x24xf32>
    %c0_1 = arith.constant 0 : index
    %c0_2 = arith.constant 0 : index
    %1 = vector.load %arg1[%c0_1, %c0_2] : memref<8x8xf32, #tpu.memory_space<vmem>>, vector<8x8xf32>
    %c0_3 = arith.constant 0 : index
    %c0_4 = arith.constant 0 : index
    %2 = vector.load %arg2[%c0_3, %c0_4] : memref<100x64xf32, #tpu.memory_space<vmem>>, vector<24x64xf32>
    %c24 = arith.constant 24 : index
    %c0_5 = arith.constant 0 : index
    %3 = vector.load %arg2[%c24, %c0_5] : memref<100x64xf32, #tpu.memory_space<vmem>>, vector<8x64xf32>
    %c32 = arith.constant 32 : index
    %c0_6 = arith.constant 0 : index
    %4 = vector.load %arg2[%c32, %c0_6] : memref<100x64xf32, #tpu.memory_space<vmem>>, vector<64x64xf32>
    %c96 = arith.constant 96 : index
    %c0_7 = arith.constant 0 : index
    %5 = vector.load %arg2[%c96, %c0_7] : memref<100x64xf32, #tpu.memory_space<vmem>>, vector<1x64xf32>
    %c97 = arith.constant 97 : index
    %c0_8 = arith.constant 0 : index
    %6 = vector.load %arg2[%c97, %c0_8] : memref<100x64xf32, #tpu.memory_space<vmem>>, vector<1x64xf32>
    %c98 = arith.constant 98 : index
    %c0_9 = arith.constant 0 : index
    %7 = vector.load %arg2[%c98, %c0_9] : memref<100x64xf32, #tpu.memory_space<vmem>>, vector<1x64xf32>
    %c99 = arith.constant 99 : index
    %c0_10 = arith.constant 0 : index
    %8 = vector.load %arg2[%c99, %c0_10] : memref<100x64xf32, #tpu.memory_space<vmem>>, vector<1x1xf32>
    %cst = arith.constant dense<0.000000e+00> : vector<8x64xf32>
    %9 = tpu.matmul %0, %2, %cst {dimension_numbers = #tpu.dot_dimension_numbers<[1], [0], [0], [1], [0, 0, 1, 1], [], []>} : vector<8x24xf32>, vector<24x64xf32>, vector<8x64xf32> -> vector<8x64xf32>
    %cst_11 = arith.constant dense<0.000000e+00> : vector<8x64xf32>
    %10 = tpu.matmul %1, %3, %cst_11 {dimension_numbers = #tpu.dot_dimension_numbers<[1], [0], [0], [1], [0, 0, 1, 1], [], []>} : vector<8x8xf32>, vector<8x64xf32>, vector<8x64xf32> -> vector<8x64xf32>
    %11 = arith.addf %9, %10 : vector<8x64xf32>
    %12 = vector.broadcast %5 : vector<1x64xf32> to vector<8x64xf32>
    %13 = arith.addf %11, %12 : vector<8x64xf32>
    %cst_12 = arith.constant 0.000000e+00 : f32
    %14 = vector.broadcast %cst_12 : f32 to vector<8x64xf32>
    %15 = arith.cmpf ogt, %13, %14 : vector<8x64xf32>
    %cst_13 = arith.constant 0.00999999977 : f32
    %16 = vector.broadcast %cst_13 : f32 to vector<8x64xf32>
    %17 = arith.mulf %16, %13 : vector<8x64xf32>
    %18 = arith.select %15, %13, %17 : vector<8x64xi1>, vector<8x64xf32>
    %cst_14 = arith.constant dense<0.000000e+00> : vector<8x64xf32>
    %19 = tpu.matmul %18, %4, %cst_14 {dimension_numbers = #tpu.dot_dimension_numbers<[1], [0], [0], [1], [0, 0, 1, 1], [], []>} : vector<8x64xf32>, vector<64x64xf32>, vector<8x64xf32> -> vector<8x64xf32>
    %20 = vector.broadcast %6 : vector<1x64xf32> to vector<8x64xf32>
    %21 = arith.addf %19, %20 : vector<8x64xf32>
    %cst_15 = arith.constant 0.000000e+00 : f32
    %22 = vector.broadcast %cst_15 : f32 to vector<8x64xf32>
    %23 = arith.cmpf ogt, %21, %22 : vector<8x64xf32>
    %cst_16 = arith.constant 0.00999999977 : f32
    %24 = vector.broadcast %cst_16 : f32 to vector<8x64xf32>
    %25 = arith.mulf %24, %21 : vector<8x64xf32>
    %26 = arith.select %23, %21, %25 : vector<8x64xi1>, vector<8x64xf32>
    %27 = vector.broadcast %7 : vector<1x64xf32> to vector<8x64xf32>
    %28 = arith.mulf %26, %27 : vector<8x64xf32>
    %cst_17 = arith.constant dense<0.000000e+00> : vector<8xf32>
    %29 = vector.multi_reduction <add>, %28, %cst_17 [1] : vector<8x64xf32> to vector<8xf32>
    %30 = vector.shape_cast %29 : vector<8xf32> to vector<8x1xf32>
    %31 = vector.broadcast %8 : vector<1x1xf32> to vector<8x1xf32>
    %32 = arith.addf %30, %31 : vector<8x1xf32>
    %c0_18 = arith.constant 0 : index
    %c0_19 = arith.constant 0 : index
    %33 = vector.load %arg3[%c0_18, %c0_19] : memref<8x1xf32, #tpu.memory_space<vmem>>, vector<8x1xf32>
    tpu.vector_store %arg3[%c0_18, %c0_19], %32 {strides = array<i32>} : memref<8x1xf32, #tpu.memory_space<vmem>>, vector<8x1xf32>,
    return
  }
}

</mosaic_0001>

<bundles_post_ra>
// kernel: reward_nets_forward.1
= control target key start
LH: loop header
LB: loop body
LE: loop exit
PB: predicated region body
PF: predicated region fallthrough
CT: control target
= control target key end

     0   :  { %vm32_vm0 = vcmask 64512   ;;  %v361_v0 = vmov 0.0   ;;  %vm362_vm1 = vmmov 0   ;;  %v363_v5 = vmov 0.0|0.0   ;;  %s444_s2 = inlined_call_operand.vmem [shape: f32[100,64], index: 2, kind: input, shape index: {}]   ;;  %s445_s1 = inlined_call_operand.vmem [shape: f32[8,8], index: 1, kind: input, shape index: {}]   ;;  %s446_s0 = inlined_call_operand.vmem [shape: f32[8,24], index: 0, kind: input, shape index: {}]   ;;  %s447_s3 = inlined_call_operand.vmem [shape: f32[8,1], index: 3, kind: output, shape index: {}]  }
   0x1   :  { %310 = vmatprep.subr.mxu1 %v361_v0  ;;  %v19_v1 = vld [vmem:[%s444_s2 + $0x18] sm:$0xff]  ;;  %312 = vmatprep.mubr.msk.f32.mxu1 %vm362_vm1, %v361_v0  ;;  %v15_v2 = vld [vmem:[%s445_s1] sm:$0xff]  ;;  %v17_v4 = vld [vmem:[%s444_s2 + $0x8] sm:$0xff]  ;;  %vm106_vm2 = vcmask 195584   ;;  %vm192_vm4 = vcmask 523264   ;;  %vm282_vm6 = vcmask 7168  }
   0x2   :  { %v16_v3 = vld [vmem:[%s444_s2] sm:$0xff]  ;;  %311 = vmatpush3.msra.mxu1 %v19_v1  ;;  %346 = vmatprep.subr.bf16.mxu0 %v363_v5  ;;  %v21_v8 = vld [vmem:[%s444_s2 + $0x28] sm:$0xff]  ;;  %v18_v10 = vld [vmem:[%s444_s2 + $0x10] sm:$0xff] }
   0x3   :  { %313 = vmatmul.mubr.msk.f32.vlgmr.msra.gmra.mrb[0].mxu1 %vm32_vm0, %v15_v2  ;;  %343 = vmatprep.subr.bf16.mxu1 %v363_v5  ;;  %v344_v6 = vpack.c.bf16 %v17_v4, %v16_v3  ;;  %v20_v7 = vld [vmem:[%s444_s2 + $0x20] sm:$0xff]  ;;  %v22_v12 = vld [vmem:[%s444_s2 + $0x30] sm:$0xff]  ;;  %v23_v13 = vld [vmem:[%s444_s2 + $0x38] sm:$0xff] }
   0x4   :  { %321 = vmatprep.mubr.msk.f32.mxu1 %vm362_vm1, %v361_v0  ;;  %v347_v9 = vpack.c.bf16 %v21_v8, %v20_v7  ;;  %340 = vmatprep.mubr.msk.f32.mxu0 %vm362_vm1, %v361_v0  ;;  %v14_v11 = vld [vmem:[%s446_s0] sm:$0xff]  ;;  %v350_v14 = vpack.c.bf16 %v23_v13, %v22_v12  ;;  %v25_v16 = vld [vmem:[%s444_s2 + $0x48] sm:$0xff]  ;;  %v26_v18 = vld [vmem:[%s444_s2 + $0x50] sm:$0xff] }
   0x5   :  { %345 = vmatpush3.bf16.msra.mxu1 %v344_v6  ;;  %v24_v15 = vld [vmem:[%s444_s2 + $0x40] sm:$0xff]  ;;  %v27_v19 = vld [vmem:[%s444_s2 + $0x58] sm:$0xff] }
   0x6   :  { %319 = vmatprep.subr.mxu1 %v361_v0  ;;  %348 = vmatpush3.bf16.msra.mxu0 %v347_v9  ;;  %v353_v17 = vpack.c.bf16 %v25_v16, %v24_v15  ;;  %v356_v20 = vpack.c.bf16 %v27_v19, %v26_v18  ;;  %v290_v23 = vld [vmem:[%s444_s2 + $0x60] ss:$0 sm:$0xff]  ;;  %v291_v30 = vld [vmem:[%s444_s2 + $0x61] ss:$0 sm:$0xff]  ;;  %v293_v35 = vld [vmem:[%s444_s2 + $0x62] ss:$0 sm:$0xff] }
   0x7   :  { %349 = vmatprep.subr.bf16.mxu0 %v363_v5  ;;  %v294_v39 = vld [vmem:[%s444_s2 + $0x63] ss:$0 sm:$0xff] }
   0x9   :  { %320 = vmatpush3.msra.mxu1 %v18_v10 }
   0xa   :  { %322 = vmatmul.mubr.msk.f32.vlgmr.msra.gmra.mrb[2].mxu1 %vm106_vm2, %v14_v11  ;;  %351 = vmatpush3.bf16.msra.mxu0 %v350_v14 }
   0xb   :  { %352 = vmatprep.subr.bf16.mxu0 %v363_v5 }
   0xe   :  { %354 = vmatpush3.bf16.msra.mxu0 %v353_v17 }
   0xf   :  { %355 = vmatprep.subr.bf16.mxu0 %v363_v5 }
  0x12   :  { %357 = vmatpush3.bf16.msra.mxu0 %v356_v20 }
  0xd6   :  { %v102_v21 = vpop.f32.mrb[0].mxu1 }
  0xd7   :  { %v314_v22 = vpop.f32.mrb[1].mxu1 }
  0xdd   :  { %v176_v24 = vpop.f32.mrb[2].mxu1 }
  0xde   :  { %v177_v25 = vadd.f32 %v176_v24, %v102_v21  ;;  %v323_v26 = vpop.f32.mrb[3].mxu1 }
  0xe0   :  { %v184_v27 = vadd.f32 %v290_v23, %v177_v25 }
  0xe2   :  { %v186_v28 = vmul.f32 0.01, %v184_v27  ;;  %vm185_vm3 = vcmp.gt.f32.partialorder %v184_v27, 0.0 }
  0xe4   :  { %v187_v29 = vsel %vm185_vm3, %v184_v27, %v186_v28 }
  0xe5   :  { %341 = vmatmul.mubr.msk.f32.vlgmr.msra.gmra.mrb[0].mxu0 %vm192_vm4, %v187_v29 }
 0x1b8   :  { %v262_v31 = vpop.f32.mrb[0].mxu0 }
 0x1b9   :  { %v263_v32 = vadd.f32 %v291_v30, %v262_v31  ;;  %v342_v33 = vpop.f32.mrb[1].mxu0 }
 0x1bb   :  { %v267_v34 = vmul.f32 0.01, %v263_v32  ;;  %vm266_vm5 = vcmp.gt.f32.partialorder %v263_v32, 0.0 }
 0x1bd   :  { %v268_v36 = vsel %vm266_vm5, %v263_v32, %v267_v34 }
 0x1be   :  { %v273_v37 = vmul.f32 %v293_v35, %v268_v36 }
 0x1c0   :  { %v274_v38 = vsel %vm192_vm4, %v273_v37, 0.0 }
 0x1c1   :  { %275 = vadd.xlane.f32.xlu0 %v274_v38 }
 0x24e   :  { %v276_v40 = vpop.xlane.xlu0 %275 }
 0x24f   :  { %v281_v41 = vadd.f32 %v294_v39, %v276_v40 }
 0x251   :  { %283 = vst.msk [vmem:[%s447_s3] sm:$0xff] %vm282_vm6, %v281_v41 }

</bundles_post_ra>
